<compile_context>
chip_gen: v7x
topology: tpu7x:2x2x1
jax: 0.10.0
libtpu: 0.0.40
codegen_flags: <defaults>
</compile_context>

<pallas_src>
import functools

import jax
import jax.numpy as jnp
import numpy as np
from jax.experimental import pallas as pl
from jax.experimental.pallas import tpu as pltpu


def _gnn_dual_fused_kernel(*refs, num_layers, relu_flags):
    """Fused forward over all layers.

    refs = (x1, x2t, adj21, adj12t,
            [w1s_l, w1ncs_l, w2st_l, w2ncs_l] * num_layers,
            o1, o2t)
      x1      [N1, D0]     side-1 features (nodes on sublanes)
      x2t     [D0, N2]     side-2 features, TRANSPOSED (nodes on lanes)
      adj21   [N1, N2]     adj_2to1
      adj12t  [N1, N2]     adj_1to2 transposed
      w1s_l   [Din, Dout]  side-1 self weight
      w1ncs_l [1, Dout]    column-sum of side-1 neighbour weight
      w2st_l  [Dout, Din]  side-2 self weight (transposed for the x2t layout)
      w2ncs_l [Dout, 1]    column-sum of side-2 neighbour weight
    """
    x1_ref, x2t_ref, adj21_ref, adj12t_ref = refs[:4]
    w_refs = refs[4:4 + 4 * num_layers]
    o1_ref, o2t_ref = refs[4 + 4 * num_layers:]

    x1 = x1_ref[...]                     # [N1, D0]
    x2t = x2t_ref[...]                   # [D0, N2]
    # Adjacency masks are layer-invariant: hoist out of the layer loop.
    mask21 = adj21_ref[...] > 0.0        # [N1, N2]
    mask12t = adj12t_ref[...] > 0.0      # [N1, N2]

    for l in range(num_layers):          # small, statically unrolled
        w1s = w_refs[4 * l][...]         # [Din, Dout]
        w1ncs = w_refs[4 * l + 1][...]   # [1, Dout]
        w2st = w_refs[4 * l + 2][...]    # [Dout, Din]
        w2ncs = w_refs[4 * l + 3][...]   # [Dout, 1]

        f2row = x2t[0:1, :]              # [1, N2]  feature-0 of side 2
        x1col = x1[:, 0:1]               # [N1, 1]  feature-0 of side 1

        # side 1: MAX of neighbours' feature-0 (VPU select + lane reduce).
        mx = jnp.max(jnp.where(mask21, f2row, -jnp.inf), axis=1, keepdims=True)
        c1 = jnp.where(mx > -jnp.inf, mx, 0.0)           # [N1, 1]; no-neigh -> 0

        # side 2: SUM of neighbours' feature-0 (VPU select + sublane reduce).
        c2 = jnp.sum(jnp.where(mask12t, x1col, 0.0), axis=0, keepdims=True)  # [1, N2]

        # Dual linear layers; neighbour term folded to a rank-1 multiply-add.
        h1 = jnp.dot(x1, w1s, preferred_element_type=jnp.float32) + c1 * w1ncs
        h2t = jnp.dot(w2st, x2t, preferred_element_type=jnp.float32) + w2ncs * c2
        if relu_flags[l]:
            h1 = jnp.maximum(h1, 0.0)
            h2t = jnp.maximum(h2t, 0.0)
        x1, x2t = h1, h2t

    o1_ref[...] = x1
    o2t_ref[...] = x2t


@jax.jit
def gnn_dual_module_forward(params, x1, x2, adj_1to2, adj_2to1):
    """GNNDualModule forward.

    params: list of (w1_self, w1_neigh, w2_self, w2_neigh), each [in_dim, out_dim]
    (so y = x @ W).  Last layer uses Identity, earlier layers ReLU, matching
    the PyTorch module construction.
    """
    num_layers = len(params)
    n1 = x1.shape[0]
    n2 = x2.shape[0]
    out_dim = params[-1][0].shape[1]
    relu_flags = tuple(l < num_layers - 1 for l in range(num_layers))

    # One-time glue (fused under jit; runs once for the whole fused module,
    # not per layer): side-2 features and adj_1to2 go in transposed.
    x2t = x2.T                           # [D0, N2]
    adj12t = adj_1to2.T                  # [N1, N2]

    flat_weights = []
    for (w1s, w1n, w2s, w2n) in params:
        flat_weights.append(w1s)                                   # [Din, Dout]
        flat_weights.append(jnp.sum(w1n, axis=0, keepdims=True))   # [1, Dout]
        flat_weights.append(w2s.T)                                 # [Dout, Din]
        flat_weights.append(jnp.sum(w2n, axis=0)[:, None])         # [Dout, 1]

    kernel = functools.partial(_gnn_dual_fused_kernel,
                               num_layers=num_layers,
                               relu_flags=relu_flags)
    vmem = pl.BlockSpec(memory_space=pltpu.MemorySpace.VMEM)
    n_in = 4 + 4 * num_layers
    out1, out2t = pl.pallas_call(
        kernel,
        out_shape=(jax.ShapeDtypeStruct((n1, out_dim), jnp.float32),
                   jax.ShapeDtypeStruct((out_dim, n2), jnp.float32)),
        in_specs=[vmem] * n_in,
        out_specs=(vmem, vmem),
    )(x1, x2t, adj_2to1, adj12t, *flat_weights)
    return out1, out2t.T


def init_gnn_dual_module(key, input_dim, hidden_dim, output_dim, num_layers=2):
    """Deterministic, bias-free Linear-like uniform init.

    Returns a list of (w1_self, w1_neigh, w2_self, w2_neigh), each stored as
    [in_dim, out_dim].
    """
    dims = [(input_dim, hidden_dim)]
    for _ in range(1, num_layers - 1):
        dims.append((hidden_dim, hidden_dim))
    dims.append((hidden_dim, output_dim))

    params = []
    for (din, dout) in dims:
        key, *ks = jax.random.split(key, 5)
        bound = 1.0 / np.sqrt(din)
        params.append(tuple(
            jax.random.uniform(k, (din, dout), jnp.float32, -bound, bound)
            for k in ks))
    return params


def _reference_forward(params, x1, x2, adj_1to2, adj_2to1):
    """Pure-numpy mirror of the PyTorch GNNDualModule semantics."""
    x1 = np.asarray(x1, np.float32)
    x2 = np.asarray(x2, np.float32)
    a12 = np.asarray(adj_1to2)
    a21 = np.asarray(adj_2to1)
    num_layers = len(params)
    for l, (w1s, w1n, w2s, w2n) in enumerate(params):
        w1s, w1n, w2s, w2n = map(np.asarray, (w1s, w1n, w2s, w2n))
        neigh1 = np.zeros_like(x1)
        neigh2 = np.zeros_like(x2)
        for i in range(x1.shape[0]):
            sel = a21[i] > 0
            if sel.any():
                neigh1[i, :] = x2[sel, 0].max()
        for i in range(x2.shape[0]):
            sel = a12[i] > 0
            if sel.any():
                neigh2[i, :] = x1[sel, 0].sum()
        h1 = x1 @ w1s + neigh1 @ w1n
        h2 = x2 @ w2s + neigh2 @ w2n
        if l < num_layers - 1:
            h1 = np.maximum(h1, 0.0)
            h2 = np.maximum(h2, 0.0)
        x1, x2 = h1, h2
    return x1, x2


if __name__ == "__main__":
    N1, N2 = 8, 8
    INPUT_DIM, HIDDEN_DIM, OUTPUT_DIM = 16, 32, 8

    key = jax.random.PRNGKey(0)
    k_x1, k_x2, k_a12, k_a21, k_w2, k_w3 = jax.random.split(key, 6)

    x1 = jax.random.normal(k_x1, (N1, INPUT_DIM), jnp.float32)
    x2 = jax.random.normal(k_x2, (N2, INPUT_DIM), jnp.float32)
    adj_1to2 = jax.random.bernoulli(k_a12, 0.4, (N2, N1)).astype(jnp.float32)
    adj_2to1 = jax.random.bernoulli(k_a21, 0.4, (N1, N2)).astype(jnp.float32)

    for num_layers, k_w in ((2, k_w2), (3, k_w3)):
        params = init_gnn_dual_module(k_w, INPUT_DIM, HIDDEN_DIM, OUTPUT_DIM,
                                      num_layers=num_layers)
        out1, out2 = gnn_dual_module_forward(params, x1, x2,
                                             adj_1to2, adj_2to1)
        out1 = jax.block_until_ready(out1)
        out2 = jax.block_until_ready(out2)

        ref1, ref2 = _reference_forward(params, x1, x2, adj_1to2, adj_2to1)
        assert np.allclose(np.asarray(out1), ref1, atol=1e-3, rtol=1e-3)
        assert np.allclose(np.asarray(out2), ref2, atol=1e-3, rtol=1e-3)

    print("KERNEL_OK")
</pallas_src>

<mosaic_0001>
module attributes {stable_mosaic.version = 11 : i64} {
  func.func @_gnn_dual_fused_kernel(%arg0: memref<8x16xf32, #tpu.memory_space<vmem>>, %arg1: memref<16x8xf32, #tpu.memory_space<vmem>>, %arg2: memref<8x8xf32, #tpu.memory_space<vmem>>, %arg3: memref<8x8xf32, #tpu.memory_space<vmem>>, %arg4: memref<16x32xf32, #tpu.memory_space<vmem>>, %arg5: memref<1x32xf32, #tpu.memory_space<vmem>>, %arg6: memref<32x16xf32, #tpu.memory_space<vmem>>, %arg7: memref<32x1xf32, #tpu.memory_space<vmem>>, %arg8: memref<32x8xf32, #tpu.memory_space<vmem>>, %arg9: memref<1x8xf32, #tpu.memory_space<vmem>>, %arg10: memref<8x32xf32, #tpu.memory_space<vmem>>, %arg11: memref<8x1xf32, #tpu.memory_space<vmem>>, %arg12: memref<8x8xf32, #tpu.memory_space<vmem>>, %arg13: memref<8x8xf32, #tpu.memory_space<vmem>>) attributes {dimension_semantics = [], scalar_prefetch = 0 : i64, scratch_operands = 0 : i64, tpu.core_type = #tpu.core_type<tc>} {
    %c0 = arith.constant 0 : index
    %c0_0 = arith.constant 0 : index
    %0 = vector.load %arg0[%c0, %c0_0] : memref<8x16xf32, #tpu.memory_space<vmem>>, vector<8x16xf32>
    %c0_1 = arith.constant 0 : index
    %c0_2 = arith.constant 0 : index
    %1 = vector.load %arg1[%c0_1, %c0_2] : memref<16x8xf32, #tpu.memory_space<vmem>>, vector<16x8xf32>
    %c0_3 = arith.constant 0 : index
    %c0_4 = arith.constant 0 : index
    %2 = vector.load %arg2[%c0_3, %c0_4] : memref<8x8xf32, #tpu.memory_space<vmem>>, vector<8x8xf32>
    %cst = arith.constant 0.000000e+00 : f32
    %3 = vector.broadcast %cst : f32 to vector<8x8xf32>
    %4 = arith.cmpf ogt, %2, %3 : vector<8x8xf32>
    %c0_5 = arith.constant 0 : index
    %c0_6 = arith.constant 0 : index
    %5 = vector.load %arg3[%c0_5, %c0_6] : memref<8x8xf32, #tpu.memory_space<vmem>>, vector<8x8xf32>
    %cst_7 = arith.constant 0.000000e+00 : f32
    %6 = vector.broadcast %cst_7 : f32 to vector<8x8xf32>
    %7 = arith.cmpf ogt, %5, %6 : vector<8x8xf32>
    %c0_8 = arith.constant 0 : index
    %c0_9 = arith.constant 0 : index
    %8 = vector.load %arg4[%c0_8, %c0_9] : memref<16x32xf32, #tpu.memory_space<vmem>>, vector<16x32xf32>
    %c0_10 = arith.constant 0 : index
    %c0_11 = arith.constant 0 : index
    %9 = vector.load %arg5[%c0_10, %c0_11] : memref<1x32xf32, #tpu.memory_space<vmem>>, vector<1x32xf32>
    %c0_12 = arith.constant 0 : index
    %c0_13 = arith.constant 0 : index
    %10 = vector.load %arg6[%c0_12, %c0_13] : memref<32x16xf32, #tpu.memory_space<vmem>>, vector<32x16xf32>
    %c0_14 = arith.constant 0 : index
    %c0_15 = arith.constant 0 : index
    %11 = vector.load %arg7[%c0_14, %c0_15] : memref<32x1xf32, #tpu.memory_space<vmem>>, vector<32x1xf32>
    %12 = vector.extract_strided_slice %1 {offsets = [0, 0], sizes = [1, 8], strides = [1, 1]} : vector<16x8xf32> to vector<1x8xf32>
    %13 = vector.extract_strided_slice %0 {offsets = [0, 0], sizes = [8, 1], strides = [1, 1]} : vector<8x16xf32> to vector<8x1xf32>
    %cst_16 = arith.constant 0xFF800000 : f32
    %14 = vector.shape_cast %12 : vector<1x8xf32> to vector<1x8xf32>
    %15 = vector.broadcast %14 : vector<1x8xf32> to vector<8x8xf32>
    %16 = vector.broadcast %cst_16 : f32 to vector<8x8xf32>
    %17 = arith.select %4, %15, %16 : vector<8x8xi1>, vector<8x8xf32>
    %cst_17 = arith.constant dense<0xFF800000> : vector<8xf32>
    %18 = vector.multi_reduction <maximumf>, %17, %cst_17 [1] : vector<8x8xf32> to vector<8xf32>
    %19 = vector.shape_cast %18 : vector<8xf32> to vector<8x1xf32>
    %cst_18 = arith.constant 0xFF800000 : f32
    %20 = vector.broadcast %cst_18 : f32 to vector<8x1xf32>
    %21 = arith.cmpf ogt, %19, %20 : vector<8x1xf32>
    %cst_19 = arith.constant 0.000000e+00 : f32
    %22 = vector.broadcast %cst_19 : f32 to vector<8x1xf32>
    %23 = arith.select %21, %19, %22 : vector<8x1xi1>, vector<8x1xf32>
    %cst_20 = arith.constant 0.000000e+00 : f32
    %24 = vector.shape_cast %13 : vector<8x1xf32> to vector<8x1xf32>
    %25 = vector.broadcast %24 : vector<8x1xf32> to vector<8x8xf32>
    %26 = vector.broadcast %cst_20 : f32 to vector<8x8xf32>
    %27 = arith.select %7, %25, %26 : vector<8x8xi1>, vector<8x8xf32>
    %cst_21 = arith.constant dense<0.000000e+00> : vector<8xf32>
    %28 = vector.multi_reduction <add>, %27, %cst_21 [0] : vector<8x8xf32> to vector<8xf32>
    %29 = vector.shape_cast %28 : vector<8xf32> to vector<1x8xf32>
    %cst_22 = arith.constant dense<0.000000e+00> : vector<8x32xf32>
    %30 = tpu.matmul %0, %8, %cst_22 {dimension_numbers = #tpu.dot_dimension_numbers<[1], [0], [0], [1], [0, 0, 1, 1], [], []>} : vector<8x16xf32>, vector<16x32xf32>, vector<8x32xf32> -> vector<8x32xf32>
    %31 = vector.broadcast %23 : vector<8x1xf32> to vector<8x32xf32>
    %32 = vector.broadcast %9 : vector<1x32xf32> to vector<8x32xf32>
    %33 = arith.mulf %31, %32 : vector<8x32xf32>
    %34 = arith.addf %30, %33 : vector<8x32xf32>
    %cst_23 = arith.constant dense<0.000000e+00> : vector<32x8xf32>
    %35 = tpu.matmul %10, %1, %cst_23 {dimension_numbers = #tpu.dot_dimension_numbers<[1], [0], [0], [1], [0, 0, 1, 1], [], []>} : vector<32x16xf32>, vector<16x8xf32>, vector<32x8xf32> -> vector<32x8xf32>
    %36 = vector.broadcast %11 : vector<32x1xf32> to vector<32x8xf32>
    %37 = vector.broadcast %29 : vector<1x8xf32> to vector<32x8xf32>
    %38 = arith.mulf %36, %37 : vector<32x8xf32>
    %39 = arith.addf %35, %38 : vector<32x8xf32>
    %cst_24 = arith.constant 0.000000e+00 : f32
    %40 = vector.broadcast %cst_24 : f32 to vector<8x32xf32>
    %41 = arith.maximumf %34, %40 : vector<8x32xf32>
    %cst_25 = arith.constant 0.000000e+00 : f32
    %42 = vector.broadcast %cst_25 : f32 to vector<32x8xf32>
    %43 = arith.maximumf %39, %42 : vector<32x8xf32>
    %c0_26 = arith.constant 0 : index
    %c0_27 = arith.constant 0 : index
    %44 = vector.load %arg8[%c0_26, %c0_27] : memref<32x8xf32, #tpu.memory_space<vmem>>, vector<32x8xf32>
    %c0_28 = arith.constant 0 : index
    %c0_29 = arith.constant 0 : index
    %45 = vector.load %arg9[%c0_28, %c0_29] : memref<1x8xf32, #tpu.memory_space<vmem>>, vector<1x8xf32>
    %c0_30 = arith.constant 0 : index
    %c0_31 = arith.constant 0 : index
    %46 = vector.load %arg10[%c0_30, %c0_31] : memref<8x32xf32, #tpu.memory_space<vmem>>, vector<8x32xf32>
    %c0_32 = arith.constant 0 : index
    %c0_33 = arith.constant 0 : index
    %47 = vector.load %arg11[%c0_32, %c0_33] : memref<8x1xf32, #tpu.memory_space<vmem>>, vector<8x1xf32>
    %48 = vector.extract_strided_slice %43 {offsets = [0, 0], sizes = [1, 8], strides = [1, 1]} : vector<32x8xf32> to vector<1x8xf32>
    %49 = vector.extract_strided_slice %41 {offsets = [0, 0], sizes = [8, 1], strides = [1, 1]} : vector<8x32xf32> to vector<8x1xf32>
    %cst_34 = arith.constant 0xFF800000 : f32
    %50 = vector.shape_cast %48 : vector<1x8xf32> to vector<1x8xf32>
    %51 = vector.broadcast %50 : vector<1x8xf32> to vector<8x8xf32>
    %52 = vector.broadcast %cst_34 : f32 to vector<8x8xf32>
    %53 = arith.select %4, %51, %52 : vector<8x8xi1>, vector<8x8xf32>
    %cst_35 = arith.constant dense<0xFF800000> : vector<8xf32>
    %54 = vector.multi_reduction <maximumf>, %53, %cst_35 [1] : vector<8x8xf32> to vector<8xf32>
    %55 = vector.shape_cast %54 : vector<8xf32> to vector<8x1xf32>
    %cst_36 = arith.constant 0xFF800000 : f32
    %56 = vector.broadcast %cst_36 : f32 to vector<8x1xf32>
    %57 = arith.cmpf ogt, %55, %56 : vector<8x1xf32>
    %cst_37 = arith.constant 0.000000e+00 : f32
    %58 = vector.broadcast %cst_37 : f32 to vector<8x1xf32>
    %59 = arith.select %57, %55, %58 : vector<8x1xi1>, vector<8x1xf32>
    %cst_38 = arith.constant 0.000000e+00 : f32
    %60 = vector.shape_cast %49 : vector<8x1xf32> to vector<8x1xf32>
    %61 = vector.broadcast %60 : vector<8x1xf32> to vector<8x8xf32>
    %62 = vector.broadcast %cst_38 : f32 to vector<8x8xf32>
    %63 = arith.select %7, %61, %62 : vector<8x8xi1>, vector<8x8xf32>
    %cst_39 = arith.constant dense<0.000000e+00> : vector<8xf32>
    %64 = vector.multi_reduction <add>, %63, %cst_39 [0] : vector<8x8xf32> to vector<8xf32>
    %65 = vector.shape_cast %64 : vector<8xf32> to vector<1x8xf32>
    %cst_40 = arith.constant dense<0.000000e+00> : vector<8x8xf32>
    %66 = tpu.matmul %41, %44, %cst_40 {dimension_numbers = #tpu.dot_dimension_numbers<[1], [0], [0], [1], [0, 0, 1, 1], [], []>} : vector<8x32xf32>, vector<32x8xf32>, vector<8x8xf32> -> vector<8x8xf32>
    %67 = vector.broadcast %59 : vector<8x1xf32> to vector<8x8xf32>
    %68 = vector.broadcast %45 : vector<1x8xf32> to vector<8x8xf32>
    %69 = arith.mulf %67, %68 : vector<8x8xf32>
    %70 = arith.addf %66, %69 : vector<8x8xf32>
    %cst_41 = arith.constant dense<0.000000e+00> : vector<8x8xf32>
    %71 = tpu.matmul %46, %43, %cst_41 {dimension_numbers = #tpu.dot_dimension_numbers<[1], [0], [0], [1], [0, 0, 1, 1], [], []>} : vector<8x32xf32>, vector<32x8xf32>, vector<8x8xf32> -> vector<8x8xf32>
    %72 = vector.broadcast %47 : vector<8x1xf32> to vector<8x8xf32>
    %73 = vector.broadcast %65 : vector<1x8xf32> to vector<8x8xf32>
    %74 = arith.mulf %72, %73 : vector<8x8xf32>
    %75 = arith.addf %71, %74 : vector<8x8xf32>
    %c0_42 = arith.constant 0 : index
    %c0_43 = arith.constant 0 : index
    %76 = vector.load %arg12[%c0_42, %c0_43] : memref<8x8xf32, #tpu.memory_space<vmem>>, vector<8x8xf32>
    tpu.vector_store %arg12[%c0_42, %c0_43], %70 {strides = array<i32>} : memref<8x8xf32, #tpu.memory_space<vmem>>, vector<8x8xf32>,
    %c0_44 = arith.constant 0 : index
    %c0_45 = arith.constant 0 : index
    %77 = vector.load %arg13[%c0_44, %c0_45] : memref<8x8xf32, #tpu.memory_space<vmem>>, vector<8x8xf32>
    tpu.vector_store %arg13[%c0_44, %c0_45], %75 {strides = array<i32>} : memref<8x8xf32, #tpu.memory_space<vmem>>, vector<8x8xf32>,
    return
  }
}

</mosaic_0001>

<bundles_post_ra>
// kernel: gnn_dual_module_forward.1
= control target key start
LH: loop header
LB: loop body
LE: loop exit
PB: predicated region body
PF: predicated region fallthrough
CT: control target
= control target key end

     0   :  { %v618_v3 = vmov 0   ;;  %v619_v4 = vmov 0.0|0.0   ;;  %vm93_vm0 = vcmask 130048   ;;  %vm620_vm1 = vmmov 0   ;;  %s814_s0 = inlined_call_operand.vmem [shape: f32[8,16], index: 0, kind: input, shape index: {}]   ;;  %s815_s1 = inlined_call_operand.vmem [shape: f32[16,8], index: 1, kind: input, shape index: {}]   ;;  %s816_s2 = inlined_call_operand.vmem [shape: f32[8,8], index: 2, kind: input, shape index: {}]   ;;  %s817_s3 = inlined_call_operand.vmem [shape: f32[8,8], index: 3, kind: input, shape index: {}]   ;;  %s818_s4 = inlined_call_operand.vmem [shape: f32[16,32], index: 4, kind: input, shape index: {}]   ;;  %s819_s5 = inlined_call_operand.vmem [shape: f32[1,32], index: 5, kind: input, shape index: {}]   ;;  %s820_s6 = inlined_call_operand.vmem [shape: f32[32,16], index: 6, kind: input, shape index: {}]   ;;  %s821_s7 = inlined_call_operand.vmem [shape: f32[32,1], index: 7, kind: input, shape index: {}]   ;;  %s822_s8 = inlined_call_operand.vmem [shape: f32[32,8], index: 8, kind: input, shape index: {}]   ;;  %s823_s9 = inlined_call_operand.vmem [shape: f32[1,8], index: 9, kind: input, shape index: {}]   ;;  %s824_s10 = inlined_call_operand.vmem [shape: f32[8,32], index: 10, kind: input, shape index: {}]   ;;  %s825_s11 = inlined_call_operand.vmem [shape: f32[8,1], index: 11, kind: input, shape index: {}]   ;;  %s826_s12 = inlined_call_operand.hbm [shape: f32[8,8], index: 12, kind: output, shape index: {0}]   ;;  %s827_s13 = inlined_call_operand.vmem [shape: f32[8,8], index: 13, kind: output, shape index: {1}]  }
   0x1   :  { %v44_v0 = vld [vmem:[%s814_s0] sm:$0xff]  ;;  %v52_v2 = vld [vmem:[%s818_s4 + $0x8] sm:$0xff]  ;;  %592 = vset.pattern.permute.xlu0 %v618_v3  ;;  %568 = vmatprep.subr.bf16.mxu0 %v619_v4  ;;  %v621_v10 = vmov 0.0  }
   0x2   :  { %v51_v1 = vld [vmem:[%s818_s4] sm:$0xff]  ;;  %v46_v7 = vld [vmem:[%s815_s1 + $0x8] sm:$0xff]  ;;  %75 = vperm.xlu0 %592, %v44_v0   ;;  %533 = vmatprep.mubr.msk.f32.mxu0 %vm620_vm1, %v621_v10 }
   0x3   :  { %v569_v5 = vpack.c.bf16 %v52_v2, %v51_v1  ;;  %v45_v6 = vld [vmem:[%s815_s1] sm:$0xff]  ;;  %593 = vset.pattern.permute.xlu1 %v618_v3  ;;  %v55_v12 = vld [vmem:[%s820_s6 + $0x8] sm:$0xff] }
   0x4   :  { %v54_v8 = vld [vmem:[%s820_s6] sm:$0xff]  ;;  %v571_v9 = vpack.c.bf16 %v46_v7, %v45_v6 }
   0x5   :  { %570 = vmatpush3.bf16.msra.mxu0 %v569_v5  ;;  %540 = vmatprep.mubr.msk.f32.mxu1 %vm93_vm0, %v54_v8  ;;  %v58_v11 = vld [vmem:[%s821_s7] sm:$0xff] }
   0x6   :  { %572 = vmatprep.subr.bf16.mxu1 %v571_v9  ;;  %168 = vperm.xlu1 %593, %v58_v11  }
   0x7   :  { %574 = vmatpush3.bf16.msra.mxu1 %v571_v9 }
   0x8   :  { %19 = vsyncpa [#allocation3], 0  ;;  %534 = vmatmul.mubr.msk.f32.vlgmr.msra.gmra.mrb[0].mxu0 %vm93_vm0, %v44_v0  ;;  %v56_v13 = vld [vmem:[%s820_s6 + $0x10] sm:$0xff]  ;;  %v59_v14 = vld [vmem:[%s821_s7 + $0x8] sm:$0xff]  ;;  %575 = vmatprep.subr.bf16.mxu0 %v619_v4  ;;  %v62_v17 = vlaneseq  ;;  %vm67_vm3 = vcmask 64512   ;;  %vm329_vm6 = vcmask 261120  }
   0x9   :  { %554 = vmatprep.mubr.msk.f32.mxu0 %vm620_vm1, %v621_v10  ;;  %581 = vmatprep.subr.bf16.mxu1 %v619_v4  ;;  %v57_v15 = vld [vmem:[%s820_s6 + $0x18] sm:$0xff]  ;;  %v60_v16 = vld [vmem:[%s821_s7 + $0x10] sm:$0xff]  ;;  %v749_v21 = vld [vmem:[%s816_s2] sm:$0xff]  ;;  %s622_s23 = smov [#allocation2]  }
   0xa   :  { %541 = vmatmul.mubr.msk.f32.vlgmr.msra.gmra.mrb[0].mxu1 %vm93_vm0, %v55_v12  ;;  %173 = vperm.xlu1 %593, %v59_v14   ;;  %v61_v18 = vld [vmem:[%s821_s7 + $0x18] sm:$0xff]  ;;  %v743_v19 = vshrl.u32 %v62_v17, 7  ;;  %vm48_vm2 = vcmp.gt.f32.partialorder %v749_v21, 0.0  ;;  %v298_v25 = vld [vmem:[%s825_s11] sm:$0xff]  ;;  %v293_v27 = vld [vmem:[%s822_s8 + $0x8] sm:$0xff]  ;;  %s489_s24 = sshll.u32 %s622_s23, 4  ;;  %s490_s24 = int_to_ptr.vmem [resolvable:$true] %s489_s24 }
   0xb   :  { %543 = vmatprep.mubr.msk.f32.mxu1 %vm93_vm0, %v56_v13  ;;  %v292_v26 = vld [vmem:[%s822_s8] sm:$0xff]  ;;  %v294_v29 = vld [vmem:[%s822_s8 + $0x10] sm:$0xff]  ;;  %v295_v30 = vld [vmem:[%s822_s8 + $0x18] sm:$0xff]  ;;  %s594_s25 = scalar_lea.vmem %s490_s24, 128  ;;  %p599_p1 = scmp.lt.s32.totalorder %s490_s24, %s490_s24 }
   0xc   :  { %v64_v20 = vsub.s32 0, %v743_v19  ;;  %v576_v28 = vpack.c.bf16 %v293_v27, %v292_v26  ;;  %v579_v31 = vpack.c.bf16 %v295_v30, %v294_v29  ;;  %v49_v32 = vld [vmem:[%s817_s3] sm:$0xff]  ;;  %p595_p0 = scmp.ne.s32.totalorder %s490_s24, %s594_s25  ;;  %p600_p2 = scmp.lt.s32.totalorder %s594_s25, %s594_s25 }
   0xd   :  { %vm50_vm4 = vcmp.gt.f32.partialorder %v49_v32, 0.0  ;;  %v501_v45 = vld [vmem:[%s819_s5] ss:$0 sm:$0xff] }
   0xe   :  { %544 = vmatmul.mubr.msk.f32.gmra.mrb[2].mxu1 %vm93_vm0, %v57_v15  ;;  %178 = vperm.xlu1 %593, %v60_v16   ;;  %v65_v22 = vrot.slane %v45_v6, %v64_v20  ;;  %v297_v9 = vld [vmem:[%s824_s10] sm:$0xff]  ;;  %p601_p3 = por %p600_p2, %p599_p1 }
   0xf   :  { %565 = vmatprep.mubr.msk.f32.mxu1 %vm620_vm1, %v621_v10  ;;  %577 = vmatpush3.bf16.msra.mxu0 %v576_v28  ;;  %v507_v19 = vld [vmem:[%s823_s9] ss:$0 sm:$0xff] }
  0x10   :  { %v66_v23 = vsel %vm48_vm2, %v65_v22, -inf  ;;  %578 = vmatprep.subr.bf16.mxu0 %v619_v4  ;;  %p602_p4 = pnand %p601_p3, %p595_p0 }
  0x11   :  { %v68_v24 = vsel %vm67_vm3, %v66_v23, -inf }
  0x12   :  { %183 = vperm.xlu1 %593, %v61_v18  }
  0x13   :  { %580 = vmatpush3.bf16.msra.mxu0 %v579_v31 }
  0x21   :  { %69 = vmax.xlane.f32.xlu0 %v68_v24 }
  0x37   :  { %404 = vperm.xlu0 %592, %v298_v25  }
  0x81   :  { %v76_v33 = vpop.permute.xlu0 %75 }
  0x82   :  { %v78_v34 = vsel %vm50_vm4, %v76_v33, 0.0 }
  0x83   :  { %v79_v35 = vsel %vm67_vm3, %v78_v34, 0.0 }
  0x84   :  { %v80_v36 = vrot.slane %v79_v35, 4 }
  0x85   :  { %v169_v38 = vpop.permute.xlu1 %168 }
  0x86   :  { %v81_v37 = vadd.f32 %v80_v36, %v79_v35 }
  0x88   :  { %v82_v39 = vrot.slane %v81_v37, 2 }
  0x89   :  { %v174_v42 = vpop.permute.xlu1 %173 }
  0x8a   :  { %v83_v40 = vadd.f32 %v82_v39, %v81_v37 }
  0x8c   :  { %v84_v43 = vrot.slane %v83_v40, 1 }
  0x8d   :  { %v179_v46 = vpop.permute.xlu1 %178 }
  0x8e   :  { %v85_v47 = vadd.f32 %v84_v43, %v83_v40 }
  0x90   :  { %v187_v50 = vmul.f32 %v174_v42, %v85_v47  ;;  %v186_v53 = vmul.f32 %v169_v38, %v85_v47  ;;  %v188_v62 = vmul.f32 %v179_v46, %v85_v47 }
  0x91   :  { %v184_v54 = vpop.permute.xlu1 %183 }
  0x92   :  { %v189_v60 = vmul.f32 %v184_v54, %v85_v47 }
  0xae   :  { %v70_v41 = vpop.xlane.xlu0 %69 }
  0xaf   :  { %vm71_vm5 = vcmp.gt.f32.partialorder %v70_v41, -inf }
  0xb0   :  { %v72_v44 = vsel %vm71_vm5, %v70_v41, 0.0 }
  0xb1   :  { %v92_v48 = vmul.f32 %v501_v45, %v72_v44 }
  0xdb   :  { %v162_v49 = vpop.f32.mrb[0].mxu0 }
  0xdc   :  { %v163_v51 = vadd.f32 %v162_v49, %v92_v48  ;;  %v535_v52 = vpop.f32.mrb[1].mxu0 }
  0xdd   :  { %v542_v55 = vpop.f32.mrb[0].mxu1 }
  0xde   :  { %v287_v56 = vmax.f32 %v163_v51, 0.0  ;;  %v274_v57 = vadd.f32 %v542_v55, %v187_v50  ;;  %v268_v58 = vpop.f32.mrb[1].mxu1 }
  0xdf   :  { %v269_v59 = vadd.f32 %v268_v58, %v186_v53 }
  0xe0   :  { %v289_v61 = vmax.f32 %v274_v57, 0.0  ;;  %311 = vperm.xlu1 %593, %v287_v56   ;;  %555 = vmatmul.mubr.msk.f32.vlgmr.msra.gmra.mrb[2].mxu0 %vm329_vm6, %v287_v56 }
  0xe1   :  { %v288_v63 = vmax.f32 %v269_v59, 0.0  ;;  %v545_v0 = vpop.f32.mrb[2].mxu1 }
  0xe2   :  { %v284_v1 = vadd.f32 %v545_v0, %v189_v60  ;;  %v278_v2 = vpop.f32.mrb[3].mxu1 }
  0xe3   :  { %v582_v3 = vpack.c.bf16 %v289_v61, %v288_v63  ;;  %v279_v5 = vadd.f32 %v278_v2, %v188_v62  ;;  %v302_v10 = vrot.slane %v288_v63, %v64_v20 }
  0xe4   :  { %v291_v6 = vmax.f32 %v284_v1, 0.0 }
  0xe5   :  { %v290_v7 = vmax.f32 %v279_v5, 0.0  ;;  %583 = vmatpush3.bf16.msra.mxu1 %v582_v3  ;;  %v303_v11 = vsel %vm48_vm2, %v302_v10, -inf }
  0xe6   :  { %584 = vmatprep.subr.bf16.mxu1 %v619_v4  ;;  %v304_v12 = vsel %vm67_vm3, %v303_v11, -inf }
  0xe7   :  { %v585_v8 = vpack.c.bf16 %v291_v6, %v290_v7 }
  0xe9   :  { %586 = vmatpush3.bf16.msra.mxu1 %v585_v8 }
  0xec   :  { %566 = vmatmul.mubr.msk.f32.vlgmr.msra.gmra.mrb[4].mxu1 %vm329_vm6, %v297_v9 }
 0x104   :  { %305 = vmax.xlane.f32.xlu1 %v304_v12 }
 0x15f   :  { %v312_v13 = vpop.permute.xlu1 %311 }
 0x160   :  { %v314_v4 = vsel %vm50_vm4, %v312_v13, 0.0 }
 0x161   :  { %v315_v14 = vsel %vm67_vm3, %v314_v4, 0.0 }
 0x162   :  { %v316_v15 = vrot.slane %v315_v14, 4 }
 0x164   :  { %v317_v17 = vadd.f32 %v316_v15, %v315_v14 }
 0x166   :  { %v318_v18 = vrot.slane %v317_v17, 2 }
 0x168   :  { %v319_v21 = vadd.f32 %v318_v18, %v317_v17 }
 0x16a   :  { %v320_v26 = vrot.slane %v319_v21, 1 }
 0x191   :  { %v306_v16 = vpop.xlane.xlu1 %305 }
 0x192   :  { %vm307_vm7 = vcmp.gt.f32.partialorder %v306_v16, -inf }
 0x193   :  { %v308_v20 = vsel %vm307_vm7, %v306_v16, 0.0 }
 0x194   :  { %v328_v22 = vmul.f32 %v507_v19, %v308_v20 }
 0x1b3   :  { %v398_v23 = vpop.f32.mrb[2].mxu0 }
 0x1b4   :  { %v399_v24 = vadd.f32 %v398_v23, %v328_v22  ;;  %v556_v25 = vpop.f32.mrb[3].mxu0 }
 0x1b6   :  { %481 = vst.msk [vmem:[#allocation2] sm:$0xff] %vm67_vm3, %v399_v24 }
 0x1b7   :  { %605 = shalt.err (!%p602_p4)
}
 0x1b8   :  { %s606_s27 = scalar_lea.hbm %s826_s12, 128 }
 0x1b9   :  { %p607_p5 = scmp.ne.s32.totalorder %s826_s12, %s606_s27  ;;  %p610_p6 = scmp.lt.u32.totalorder %s606_s27, %s826_s12 }
 0x1bb   :  { %p612_p7 = pnand %p610_p6, %p607_p5 }
 0x1bd   :  { %615 = shalt.err (!%p612_p7)
}
 0x1be   :  { %492 = dma.vmem_to_hbm [thread:$0]  %s490_s24, 128, %s826_s12, [#allocation3]   ;;  %v321_v27 = vadd.f32 %v320_v26, %v319_v21  ;;  %v405_v28 = vpop.permute.xlu0 %404 }
 0x1bf   :  { %v477_v30 = vpop.f32.mrb[4].mxu1 }
 0x1c0   :  { %v407_v29 = vmul.f32 %v405_v28, %v321_v27  ;;  %v567_v32 = vpop.f32.mrb[5].mxu1 }
 0x1c2   :  { %v478_v31 = vadd.f32 %v477_v30, %v407_v29 }
 0x1c4   :  { %482 = vst.msk [vmem:[%s827_s13] sm:$0xff] %vm67_vm3, %v478_v31 }
 0x1c5   :  { %616 = dma.done.wait [#allocation3], 128  }
 0x1c6   :  { %617 = vsyncadd [#allocation3], 4294967168 }
 0x1c7   :  { %500 = vsyncpa [#allocation3], 1 }

</bundles_post_ra>
